<compile_context>
chip_gen: v5e
topology: v5e:2x2
jax: 0.10.0
libtpu: 0.0.40
codegen_flags: <defaults>
</compile_context>

<pallas_src>
import functools

import jax
import jax.numpy as jnp
from jax import lax
from jax.experimental import pallas as pl
from jax.experimental.pallas import tpu as pltpu


NEG_INF = -1e30  # finite large-negative; scores stay f32 (do NOT cast masked scores to bf16)


def _tile(dim, target):
    """Largest clean tile: full dim if small/ragged, else `target` (multiple of 8/128)."""
    if dim <= target:
        return dim
    return target if dim % target == 0 else dim


def _attn_tile(n):
    """q/k tile for the flash grid (256-class tiles per the v7x/v6e VMEM budget)."""
    for t in (256, 128):
        if n >= t and n % t == 0:
            return t
    return n  # short / ragged sequences: single block (test path)


# ------------------------ qkv projection (head-grouped) ----------------------
# Computes acc[g, m, d] = sum_k x[m, k] * w3[g, k, d] with g = comp*H + h, so the
# output lands directly in a (3, H, M, D) layout (no transpose of the activations).

def _qkv_proj_kernel(x_ref, w_ref, o_ref, acc_ref):
    k = pl.program_id(2)

    @pl.when(k == 0)
    def _():
        acc_ref[...] = jnp.zeros_like(acc_ref)

    acc_ref[...] += jnp.dot(x_ref[...], w_ref[...], preferred_element_type=jnp.float32)

    @pl.when(k == pl.num_programs(2) - 1)
    def _():
        o_ref[...] = acc_ref[...].astype(o_ref.dtype)


def _qkv_proj(x2d, w3):
    M, K = x2d.shape
    G, _, D = w3.shape
    tm = _tile(M, 256)
    tk = _tile(K, 512)
    return pl.pallas_call(
        _qkv_proj_kernel,
        out_shape=jax.ShapeDtypeStruct((G, M, D), x2d.dtype),
        grid=(M // tm, G, K // tk),
        in_specs=[
            pl.BlockSpec((tm, tk), lambda i, g, k: (i, k)),
            pl.BlockSpec((None, tk, D), lambda i, g, k: (g, k, 0)),
        ],
        out_specs=pl.BlockSpec((None, tm, D), lambda i, g, k: (g, i, 0)),
        scratch_shapes=[pltpu.VMEM((tm, D), jnp.float32)],
        compiler_params=pltpu.CompilerParams(
            dimension_semantics=("parallel", "parallel", "arbitrary")),
    )(x2d, w3)


# ---------------------- output projection (contract over heads) --------------
# out[m, c] = sum_h o[h, m, :] @ w_proj[c, h*D:(h+1)*D]^T — reads the attention output
# in its native (H, M, D) layout, so no (B,H,N,D)->(B,N,C) transpose is materialized.

def _out_proj_kernel(o_ref, w_ref, y_ref, acc_ref):
    h = pl.program_id(2)

    @pl.when(h == 0)
    def _():
        acc_ref[...] = jnp.zeros_like(acc_ref)

    acc_ref[...] += jnp.dot(o_ref[...], w_ref[...], preferred_element_type=jnp.float32)

    @pl.when(h == pl.num_programs(2) - 1)
    def _():
        y_ref[...] = acc_ref[...].astype(y_ref.dtype)


def _out_proj(o3, wp):
    H, M, D = o3.shape
    C = wp.shape[-1]
    tm = _tile(M, 256)
    tn = _tile(C, 256)
    return pl.pallas_call(
        _out_proj_kernel,
        out_shape=jax.ShapeDtypeStruct((M, C), o3.dtype),
        grid=(M // tm, C // tn, H),
        in_specs=[
            pl.BlockSpec((None, tm, D), lambda i, j, h: (h, i, 0)),
            pl.BlockSpec((None, D, tn), lambda i, j, h: (h, 0, j)),
        ],
        out_specs=pl.BlockSpec((tm, tn), lambda i, j, h: (i, j)),
        scratch_shapes=[pltpu.VMEM((tm, tn), jnp.float32)],
        compiler_params=pltpu.CompilerParams(
            dimension_semantics=("parallel", "parallel", "arbitrary")),
    )(o3, wp)


# --------------------- fused RoPE + causal flash attention -------------------

def _roll_half(x):
    """concat(x2, x1) along the last dim (sign is pre-folded into the sin table)."""
    d = x.shape[-1]
    if d % 128 == 0:
        # lane-rotation on the XLU slot (free w.r.t. VPU/MXU) for real head dims
        return pltpu.roll(x, d // 2, axis=-1)
    # tiny head dims (test path): plain slice + concat
    return jnp.concatenate([x[:, d // 2:], x[:, : d // 2]], axis=-1)


def _flash_attn_kernel(q_ref, k_ref, v_ref, cq_ref, sq_ref, ck_ref, sk_ref,
                       o_ref, q_sc, m_sc, l_sc, acc_sc, *, scale):
    qi = pl.program_id(2)
    kj = pl.program_id(3)

    @pl.when(kj == 0)
    def _init():
        # RoPE (+ softmax scale folded into q) once per (b, h, q-tile); keep in VMEM.
        qf = q_ref[...].astype(jnp.float32)
        q_rot = qf * cq_ref[...] + _roll_half(qf) * sq_ref[...]
        q_sc[...] = (q_rot * scale).astype(q_sc.dtype)
        m_sc[...] = jnp.full_like(m_sc, -jnp.inf)
        l_sc[...] = jnp.zeros_like(l_sc)
        acc_sc[...] = jnp.zeros_like(acc_sc)

    def _scores():
        kf = k_ref[...].astype(jnp.float32)
        k_rot = (kf * ck_ref[...] + _roll_half(kf) * sk_ref[...]).astype(k_ref.dtype)
        # q @ k^T with operands in the input dtype (bf16-friendly), f32 accumulation.
        return lax.dot_general(q_sc[...], k_rot, (((1,), (1,)), ((), ())),
                               preferred_element_type=jnp.float32)

    def _update(s):
        m_prev = m_sc[...]
        m_new = jnp.maximum(m_prev, s.max(axis=-1, keepdims=True))
        alpha = jnp.exp(m_prev - m_new)
        p = jnp.exp(s - m_new)
        l_sc[...] = alpha * l_sc[...] + p.sum(axis=-1, keepdims=True)
        acc_sc[...] = alpha * acc_sc[...] + jnp.dot(
            p.astype(v_ref.dtype), v_ref[...], preferred_element_type=jnp.float32)
        m_sc[...] = m_new

    @pl.when(kj < qi)      # fully-visible lower-triangle block: no mask work at all
    def _off_diag():
        _update(_scores())

    @pl.when(kj == qi)     # diagonal block (block_q == block_k): local causal mask
    def _diag():
        s = _scores()
        row = lax.broadcasted_iota(jnp.int32, s.shape, 0)
        col = lax.broadcasted_iota(jnp.int32, s.shape, 1)
        _update(jnp.where(col <= row, s, NEG_INF))

    # kj > qi: skipped entirely; its k/v/cos/sin DMAs are elided via clamped index_maps.

    @pl.when(kj == pl.num_programs(3) - 1)
    def _finalize():
        inv = pl.reciprocal(l_sc[...], approx=True)   # EUP slot, avoids a VPU divide
        o_ref[...] = (acc_sc[...] * inv).astype(o_ref.dtype)


def _flash_attention(qkv5, cos, sin, *, scale):
    _, H, B, N, D = qkv5.shape
    t = _attn_tile(N)          # block_q == block_k (diagonal-block mask relies on it)
    gq = N // t
    gk = N // t

    kernel = functools.partial(_flash_attn_kernel, scale=scale)

    def _kv_idx(qi, kj):
        # clamp so masked-out (kj > qi) blocks keep the previous block index -> no DMA
        return jnp.minimum(kj, qi)

    qkv_spec = lambda comp: pl.BlockSpec(
        (None, None, None, t, D),
        lambda b, h, qi, kj, c=comp: (c, h, b, (qi if c == 0 else _kv_idx(qi, kj)), 0))

    return pl.pallas_call(
        kernel,
        out_shape=jax.ShapeDtypeStruct((H, B, N, D), qkv5.dtype),
        grid=(B, H, gq, gk),
        in_specs=[
            qkv_spec(0),                                   # q   (indexed by qi)
            qkv_spec(1),                                   # k   (indexed by min(kj, qi))
            qkv_spec(2),                                   # v   (indexed by min(kj, qi))
            pl.BlockSpec((None, t, D), lambda b, h, qi, kj: (b, qi, 0)),             # cos_q
            pl.BlockSpec((None, t, D), lambda b, h, qi, kj: (b, qi, 0)),             # sin_q
            pl.BlockSpec((None, t, D), lambda b, h, qi, kj: (b, _kv_idx(qi, kj), 0)),  # cos_k
            pl.BlockSpec((None, t, D), lambda b, h, qi, kj: (b, _kv_idx(qi, kj), 0)),  # sin_k
        ],
        out_specs=pl.BlockSpec((None, None, t, D), lambda b, h, qi, kj: (h, b, qi, 0)),
        scratch_shapes=[
            pltpu.VMEM((t, D), qkv5.dtype),    # RoPE'd + scaled q tile
            pltpu.VMEM((t, 1), jnp.float32),   # running max m
            pltpu.VMEM((t, 1), jnp.float32),   # running sum l
            pltpu.VMEM((t, D), jnp.float32),   # un-normalized output accumulator
        ],
        compiler_params=pltpu.CompilerParams(
            dimension_semantics=("parallel", "parallel", "parallel", "arbitrary"),
            vmem_limit_bytes=32 * 1024 * 1024,  # deployment knob; safe on v5e/v6e/v7x
        ),
    )(qkv5, qkv5, qkv5, cos, sin, cos, sin)


# --------------------------------- wrapper -----------------------------------

def attention_forward(x, position_ids, w_qkv, w_proj, *, n_head, rope_theta):
    B, N, C = x.shape
    H = n_head
    D = C // H
    M = B * N
    x2d = x.reshape(M, C)

    # qkv projection written directly in a (3, H, M, D) head-grouped layout.
    # w_qkv rows are ordered comp*C + h*D + d  ->  (3H, D, C) -> (3H, C, D).
    w3 = jnp.transpose(w_qkv.reshape(3 * H, D, C), (0, 2, 1))
    qkv = _qkv_proj(x2d, w3).reshape(3, H, B, N, D)         # free reshape

    # rotary tables, kept in f32 for precision; sin is pre-multiplied by the
    # rotate_half sign vector so the kernel only needs an (unsigned) half-roll.
    inv_freq = 1.0 / (rope_theta ** (jnp.arange(0, D, 2, dtype=jnp.float32) / D))
    freqs = position_ids.astype(jnp.float32)[:, :, None] * inv_freq[None, None, :]
    emb = jnp.concatenate([freqs, freqs], axis=-1)          # (B, N, D)
    cos = jnp.cos(emb)
    sign = jnp.concatenate([-jnp.ones((D // 2,), jnp.float32),
                            jnp.ones((D // 2,), jnp.float32)])
    sin = jnp.sin(emb) * sign

    o = _flash_attention(qkv, cos, sin, scale=float(D) ** -0.5)   # (H, B, N, D)

    # output projection reads the (H, M, D) layout directly (contraction over heads).
    wp = jnp.transpose(w_proj.reshape(C, H, D), (1, 2, 0))  # (H, D, C)
    out = _out_proj(o.reshape(H, M, D), wp)                 # (M, C)
    return out.reshape(B, N, C)


# ------------------------------ pure-JAX reference ---------------------------

def reference_forward(x, position_ids, w_qkv, w_proj, *, n_head, rope_theta):
    B, N, C = x.shape
    D = C // n_head
    qkv = (x.reshape(B * N, C) @ w_qkv.T).reshape(B, N, 3, n_head, D)
    qkv = jnp.transpose(qkv, (2, 0, 3, 1, 4))
    q, k, v = qkv[0], qkv[1], qkv[2]

    inv_freq = 1.0 / (rope_theta ** (jnp.arange(0, D, 2, dtype=jnp.float32) / D))
    freqs = position_ids.astype(jnp.float32)[:, :, None] * inv_freq[None, None, :]
    emb = jnp.concatenate([freqs, freqs], axis=-1)
    cos = jnp.cos(emb)[:, None, :, :]
    sin = jnp.sin(emb)[:, None, :, :]

    def rotate_half(t):
        t1 = t[..., : D // 2]
        t2 = t[..., D // 2:]
        return jnp.concatenate([-t2, t1], axis=-1)

    q = q * cos + rotate_half(q) * sin
    k = k * cos + rotate_half(k) * sin

    scores = jnp.einsum("bhqd,bhkd->bhqk", q, k) * (float(D) ** -0.5)
    mask = jnp.tril(jnp.ones((N, N), dtype=bool))
    scores = jnp.where(mask, scores, -1e30)
    p = jax.nn.softmax(scores, axis=-1)
    o = jnp.einsum("bhqk,bhkd->bhqd", p, v)
    o = jnp.transpose(o, (0, 2, 1, 3)).reshape(B, N, C)
    return (o.reshape(B * N, C) @ w_proj.T).reshape(B, N, C)


# ----------------------------------- main -------------------------------------

if __name__ == "__main__":
    B, N, d_model, n_head = 2, 8, 32, 4
    rope_theta = 10000.0
    dtype = jnp.float32

    key = jax.random.PRNGKey(0)
    kx, kqkv, kproj = jax.random.split(key, 3)

    # nn.Linear default init: U(-1/sqrt(in), 1/sqrt(in)); weight is (out, in)
    bound = 1.0 / (d_model ** 0.5)
    w_qkv = jax.random.uniform(kqkv, (3 * d_model, d_model), dtype, -bound, bound)
    w_proj = jax.random.uniform(kproj, (d_model, d_model), dtype, -bound, bound)

    x = jax.random.normal(kx, (B, N, d_model), dtype)
    position_ids = jnp.broadcast_to(jnp.arange(N, dtype=jnp.int32)[None, :], (B, N))

    out = attention_forward(
        x, position_ids, w_qkv, w_proj, n_head=n_head, rope_theta=rope_theta
    )
    out = jax.block_until_ready(out)

    ref = reference_forward(
        x, position_ids, w_qkv, w_proj, n_head=n_head, rope_theta=rope_theta
    )
    assert out.shape == (B, N, d_model)
    # tolerance leaves margin for the approximate (EUP) reciprocal in the softmax finalize
    assert jnp.allclose(out, ref, atol=2e-3, rtol=2e-3), "mismatch vs pure-JAX reference"

    print("KERNEL_OK")
</pallas_src>

<mosaic_0001>
module attributes {stable_mosaic.version = 11 : i64} {
  func.func @_qkv_proj_kernel(%arg0: i32, %arg1: i32, %arg2: i32, %arg3: memref<16x32xf32, #tpu.memory_space<vmem>>, %arg4: memref<1x32x8xf32, #tpu.memory_space<vmem>>, %arg5: memref<1x16x8xf32, #tpu.memory_space<vmem>>, %arg6: memref<16x8xf32, #tpu.memory_space<vmem>>) attributes {dimension_semantics = [#tpu.dimension_semantics<parallel>, #tpu.dimension_semantics<parallel>, #tpu.dimension_semantics<arbitrary>], iteration_bounds = array<i64: 1, 12, 1>, scalar_prefetch = 0 : i64, scratch_operands = 1 : i64, tpu.core_type = #tpu.core_type<tc>, window_params = [{transform_indices = @transform_0, window_bounds = array<i64: 16, 32>}, {transform_indices = @transform_1, window_bounds = array<i64: 1, 32, 8>}, {transform_indices = @transform_2, window_bounds = array<i64: 1, 16, 8>}]} {
    %c0_i32 = arith.constant 0 : i32
    %0 = arith.cmpi eq, %arg2, %c0_i32 : i32
    %1 = arith.extui %0 : i1 to i32
    %c0_i32_0 = arith.constant 0 : i32
    %2 = arith.cmpi ne, %1, %c0_i32_0 : i32
    scf.if %2 {
      %cst_11 = arith.constant 0.000000e+00 : f32
      %13 = vector.broadcast %cst_11 : f32 to vector<16x8xf32>
      %c0_12 = arith.constant 0 : index
      %c0_13 = arith.constant 0 : index
      %14 = vector.load %arg6[%c0_12, %c0_13] : memref<16x8xf32, #tpu.memory_space<vmem>>, vector<16x8xf32>
      tpu.vector_store %arg6[%c0_12, %c0_13], %13 {strides = array<i32>} : memref<16x8xf32, #tpu.memory_space<vmem>>, vector<16x8xf32>,
    } else {
    }
    %c0 = arith.constant 0 : index
    %c0_1 = arith.constant 0 : index
    %3 = vector.load %arg6[%c0, %c0_1] : memref<16x8xf32, #tpu.memory_space<vmem>>, vector<16x8xf32>
    %c0_2 = arith.constant 0 : index
    %c0_3 = arith.constant 0 : index
    %4 = vector.load %arg3[%c0_2, %c0_3] : memref<16x32xf32, #tpu.memory_space<vmem>>, vector<16x32xf32>
    %c0_4 = arith.constant 0 : index
    %c0_5 = arith.constant 0 : index
    %c0_6 = arith.constant 0 : index
    %5 = vector.load %arg4[%c0_4, %c0_5, %c0_6] : memref<1x32x8xf32, #tpu.memory_space<vmem>>, vector<1x32x8xf32>
    %6 = vector.shape_cast %5 : vector<1x32x8xf32> to vector<32x8xf32>
    %cst = arith.constant dense<0.000000e+00> : vector<16x8xf32>
    %7 = tpu.matmul %4, %6, %cst {dimension_numbers = #tpu.dot_dimension_numbers<[1], [0], [0], [1], [0, 0, 1, 1], [], []>} : vector<16x32xf32>, vector<32x8xf32>, vector<16x8xf32> -> vector<16x8xf32>
    %8 = arith.addf %3, %7 : vector<16x8xf32>
    %c0_7 = arith.constant 0 : index
    %c0_8 = arith.constant 0 : index
    %9 = vector.load %arg6[%c0_7, %c0_8] : memref<16x8xf32, #tpu.memory_space<vmem>>, vector<16x8xf32>
    tpu.vector_store %arg6[%c0_7, %c0_8], %8 {strides = array<i32>} : memref<16x8xf32, #tpu.memory_space<vmem>>, vector<16x8xf32>,
    %c0_i32_9 = arith.constant 0 : i32
    %10 = arith.cmpi eq, %arg2, %c0_i32_9 : i32
    %11 = arith.extui %10 : i1 to i32
    %c0_i32_10 = arith.constant 0 : i32
    %12 = arith.cmpi ne, %11, %c0_i32_10 : i32
    scf.if %12 {
      %c0_11 = arith.constant 0 : index
      %c0_12 = arith.constant 0 : index
      %13 = vector.load %arg6[%c0_11, %c0_12] : memref<16x8xf32, #tpu.memory_space<vmem>>, vector<16x8xf32>
      %c0_13 = arith.constant 0 : index
      %c0_14 = arith.constant 0 : index
      %c0_15 = arith.constant 0 : index
      %14 = vector.load %arg5[%c0_13, %c0_14, %c0_15] : memref<1x16x8xf32, #tpu.memory_space<vmem>>, vector<1x16x8xf32>
      %15 = vector.shape_cast %14 : vector<1x16x8xf32> to vector<16x8xf32>
      %16 = vector.shape_cast %13 : vector<16x8xf32> to vector<1x16x8xf32>
      tpu.vector_store %arg5[%c0_13, %c0_14, %c0_15], %16 {strides = array<i32>} : memref<1x16x8xf32, #tpu.memory_space<vmem>>, vector<1x16x8xf32>,
    } else {
    }
    return
  }
  func.func @transform_0(%arg0: i32, %arg1: i32, %arg2: i32) -> (i32, i32) {
    %c0_i32 = arith.constant 0 : i32
    return %arg0, %arg2 : i32, i32
  }
  func.func @transform_1(%arg0: i32, %arg1: i32, %arg2: i32) -> (i32, i32, i32) {
    %c0_i32 = arith.constant 0 : i32
    %c0_i32_0 = arith.constant 0 : i32
    return %arg1, %arg2, %c0_i32 : i32, i32, i32
  }
  func.func @transform_2(%arg0: i32, %arg1: i32, %arg2: i32) -> (i32, i32, i32) {
    %c0_i32 = arith.constant 0 : i32
    %c0_i32_0 = arith.constant 0 : i32
    return %arg1, %arg0, %c0_i32 : i32, i32, i32
  }
}

</mosaic_0001>

<bundles_post_ra>
// kernel: tpu_custom_call.1
= control target key start
LH: loop header
LB: loop body
LE: loop exit
PB: predicated region body
PF: predicated region fallthrough
CT: control target
= control target key end

     0   :  { %s473_s9 = smov 0   ;;  %s475_s10 = smov 0   ;;  %s522_s0 = inlined_call_operand.vmem [shape: f32[16,32], index: 0, kind: input, shape index: {}]   ;;  %s523_s1 = inlined_call_operand.vmem [shape: f32[12,32,8], index: 1, kind: input, shape index: {}]   ;;  %s524_s2 = inlined_call_operand.vmem [shape: f32[12,16,8], index: 2, kind: output, shape index: {}]  }
   0x1   :  { %s477_s11 = smov 0  }
   0x2 LB: > { %s27_s12 = sadd.s32 1, %s451_s10  ;;  %p393_p0 = scmp.ge.s32.totalorder %s455_s11, 1  ;;  %s455_s11 = sphi %s477_s11, %s12_s11   ;;  %s451_s10 = sphi %s475_s10, %s526_s10   ;;  %s447_s9 = sphi %s473_s9, %s525_s9  }
   0x3   : > { %p29_p1 = scmp.ge.s32.totalorder %s27_s12, 12  ;;  %p156_p2 = scmp.lt.s32.totalorder %s455_s11, 13 }
   0x5   : > { %s528_s12 = smov (%p29_p1, %s27_s12), 0  ;;  %p157_p3 = pnand %p393_p0, %p156_p2 }
   0x6   : > { %p204_p4 = scmp.lt.s32.totalorder (!%p157_p3), %s447_s9, 11 }
   0x7   : > { %160 = sbr.rel (%p157_p3) target bundleno = 161 (0xa1), region = 28 }
   0xc   : > { %vm227_vm0 = vcmask 64512   ;;  %v457_v0 = vmov 0.0   ;;  %s530_s9 = smov (!%p204_p4, %s447_s9), 11  ;;  %v232_v5 = vld [vmem:[%s522_s0] sm:$0xff]  ;;  %vm238_vm1 = vcmask 261120   ;;  %v233_v6 = vld [vmem:[%s522_s0 + $0x8] sm:$0xff] }
   0xd   : > { %228 = vst.msk [vmem:[#allocation2] sm:$0xff] %vm227_vm0, %v457_v0  ;;  %s402_s13 = sshll.u32 %s530_s9, 5  ;;  %s403_s21 = sshll.u32 %s530_s9, 4 }
   0xe   : > { %229 = vst.msk [vmem:[#allocation2 + $0x8] sm:$0xff] %vm227_vm0, %v457_v0  ;;  %s211_s16 = scalar_lea.vmem %s523_s1, %s402_s13  ;;  %s221_s24 = scalar_lea.vmem %s524_s2, %s403_s21 }
   0xf   : > { %v237_v1 = vld [vmem:[%s211_s16 + $0x18] sm:$0xff]  ;;  %v236_v2 = vld [vmem:[%s211_s16 + $0x10] sm:$0xff]  ;;  %v235_v3 = vld [vmem:[%s211_s16 + $0x8] sm:$0xff] }
  0x10   : > { %257 = vmatpush.msra.mxu0 %v237_v1  ;;  %404 = vmatpush.msra.mxu1 %v237_v1  ;;  %v234_v4 = vld [vmem:[%s211_s16] sm:$0xff] }
  0x12   : > { %258 = vmatpush.msra.mxu0 %v236_v2  ;;  %405 = vmatpush.msra.mxu1 %v236_v2 }
  0x14   : > { %259 = vmatpush.msra.mxu0 %v235_v3  ;;  %406 = vmatpush.msra.mxu1 %v235_v3  ;;  %v230_v7 = vld [vmem:[#allocation2] sm:$0xff] }
  0x15   : > { %v231_v8 = vld [vmem:[#allocation2 + $0x8] sm:$0xff] }
  0x16   : > { %260 = vmatpush.msra.mxu0 %v234_v4  ;;  %407 = vmatpush.msra.mxu1 %v234_v4 }
  0x17   : > { %398 = vmatmul.msk.f32.vlgmr.msra.gmra.mxu0 %vm238_vm1, %v232_v5  ;;  %399 = vmatmul.msk.f32.vlgmr.msra.gmra.mxu1 %vm238_vm1, %v233_v6 }
  0x94   : > { %v262_v9 = vpop.f32.mrf.mxu0  ;;  %v265_v10 = vpop.f32.mrf.mxu1 }
  0x95   : > { %v268_v11 = vadd.f32 %v262_v9, %v230_v7  ;;  %v269_v12 = vadd.f32 %v265_v10, %v231_v8 }
  0x97   : > { %271 = vst.msk [vmem:[#allocation2] sm:$0xff] %vm227_vm0, %v268_v11 }
  0x98   : > { %272 = vst.msk [vmem:[#allocation2 + $0x8] sm:$0xff] %vm227_vm0, %v269_v12 }
  0x9e   : > { %v276_v13 = vld [vmem:[#allocation2] sm:$0xff] }
  0x9f   : > { %278 = vst.msk [vmem:[%s221_s24] sm:$0xff] %vm227_vm0, %v276_v13  ;;  %v277_v14 = vld [vmem:[#allocation2 + $0x8] sm:$0xff] }
  0xa0   : > { %279 = vst.msk [vmem:[%s221_s24 + $0x8] sm:$0xff] %vm227_vm0, %v277_v14 }
  0xa1 PF: > { %s12_s11 = sadd.s32 1, %s455_s11   ;;  %s525_s9 = smov %s451_s10 }
  0xa2   : > { %p9_p5 = scmp.ge.s32.totalorder %s12_s11, 14   ;;  %s526_s10 = smov %s528_s12 }
  0xa4   :  { %11 = sbr.rel (!%p9_p5) target bundleno = 2 (0x2), region = 69 }

</bundles_post_ra>
